<compile_context>
chip_gen: v7x
topology: tpu7x:2x2x1
jax: 0.10.0
libtpu: 0.0.40
codegen_flags: <defaults>
</compile_context>

<pallas_src>
import jax
import jax.numpy as jnp
from jax import lax
from jax.experimental import pallas as pl
from jax.experimental.pallas import tpu as pltpu

BN_EPS = 1e-5
LANE = 128
MAX_TILE_B = 4096   # per review: 2-4K batch tile amortizes ~0.35us per-step overhead


def _round_up(x, m):
    return ((x + m - 1) // m) * m


def mlp_kernel(x_ref, w1_ref, b1_ref, w2_ref, b2_ref, w3_ref, b3_ref, out_ref):
    """Fused [Linear(+foldedBN) -> ReLU] x2 -> Linear(., 1), feature-major inside.

    x_ref  : (TILE_B, IN)  f32   batch-major straight from HBM
    w1_ref : (H1, IN)      bf16  (eval-BN folded)
    b1_ref : (H1, 1)       f32
    w2_ref : (H2, H1)      bf16  (eval-BN folded)
    b2_ref : (H2, 1)       f32
    w3_ref : (H2, 1)       f32   output head (used on VPU, not MXU)
    b3_ref : (1, 1)        f32
    out_ref: (1, TILE_B)   f32   lane-dense output row (batch on the lane axis)
    """
    x = x_ref[...].astype(jnp.bfloat16)   # in-kernel cast rides the VPU

    # hidden 1: contract on the feature axis (NT matmul) so the result is
    # already feature-major (H1, TILE_B); batch stays on the lane axis.
    z1 = lax.dot_general(w1_ref[...], x,
                         dimension_numbers=(((1,), (1,)), ((), ())),
                         preferred_element_type=jnp.float32) + b1_ref[...]
    h1 = jnp.maximum(z1, 0.0).astype(jnp.bfloat16)      # Dropout = identity (eval)

    # hidden 2: Linear(+folded BN) -> ReLU
    z2 = jnp.dot(w2_ref[...], h1, preferred_element_type=jnp.float32) + b2_ref[...]
    h2 = jnp.maximum(z2, 0.0)                           # keep f32 (no MXU use below)

    # output head: M=1 matmul replaced by VPU multiply + sublane reduction
    out_ref[...] = (jnp.sum(w3_ref[...] * h2, axis=0, keepdims=True)
                    + b3_ref[...])


def fold_bn_params(p):
    """Fold eval-mode BatchNorm into the Linear layers; cast MXU matrices to bf16."""
    s1 = p["g1"] * lax.rsqrt(p["v1"] + BN_EPS)
    s2 = p["g2"] * lax.rsqrt(p["v2"] + BN_EPS)
    w1 = (p["w1"] * s1[:, None]).astype(jnp.bfloat16)                          # (H1, IN)
    b1 = (((p["b1"] - p["m1"]) * s1) + p["be1"])[:, None].astype(jnp.float32)  # (H1, 1)
    w2 = (p["w2"] * s2[:, None]).astype(jnp.bfloat16)                          # (H2, H1)
    b2 = (((p["b2"] - p["m2"]) * s2) + p["be2"])[:, None].astype(jnp.float32)  # (H2, 1)
    w3 = jnp.transpose(p["w3"]).astype(jnp.float32)                            # (H2, 1)
    b3 = p["b3"][:, None].astype(jnp.float32)                                  # (1, 1)
    return w1, b1, w2, b2, w3, b3


def _pick_tile_b(B):
    """Batch tile: multiple of 128 lanes, <= MAX_TILE_B, >= 2 tiles when possible."""
    b128 = _round_up(B, LANE)
    if b128 <= LANE:
        return LANE
    # At least two grid steps so v7x's two TensorCores both get work (the
    # "parallel" semantics flag is a no-op on single-TC v5e/v6e).
    return min(MAX_TILE_B, _round_up(pl.cdiv(b128, 2), LANE))


def neural_network_forward(x, params):
    """x: (B, input_dim) f32; params: PyTorch-layout dict.  Returns (B, 1) f32."""
    B, in_dim = x.shape
    w1, b1, w2, b2, w3, b3 = fold_bn_params(params)
    h1 = w1.shape[0]
    h2 = w2.shape[0]

    tile_b = _pick_tile_b(B)
    b_pad = _round_up(B, tile_b)
    num_tiles = b_pad // tile_b

    # Ragged batch: zero-pad rows only (no transpose/cast pass over x).
    if b_pad != B:
        x = jnp.pad(x, ((0, b_pad - B), (0, 0)))

    def const(shape):
        return pl.BlockSpec(shape, lambda i: (0, 0))    # VMEM-resident across tiles

    out = pl.pallas_call(
        mlp_kernel,
        out_shape=jax.ShapeDtypeStruct((1, b_pad), jnp.float32),
        grid=(num_tiles,),
        in_specs=[
            pl.BlockSpec((tile_b, in_dim), lambda i: (i, 0)),   # x tile (pipelined)
            const((h1, in_dim)), const((h1, 1)),                # layer 1 (folded BN)
            const((h2, h1)), const((h2, 1)),                    # layer 2 (folded BN)
            const((h2, 1)), const((1, 1)),                      # output head
        ],
        out_specs=pl.BlockSpec((1, tile_b), lambda i: (0, i)),
        compiler_params=pltpu.CompilerParams(
            dimension_semantics=("parallel",),
            vmem_limit_bytes=32 * 1024 * 1024),   # v5e default is only 16 MiB
    )(x, w1, b1, w2, b2, w3, b3)

    return out[0, :B].reshape(B, 1)


def init_params(key, input_dim, hidden_dims):
    """Deterministic parameters with PyTorch-native layouts: wN is (out, in)."""
    assert len(hidden_dims) == 2, "kernel is written for 2 hidden layers"
    h1, h2 = hidden_dims
    ks = jax.random.split(key, 11)

    def lin(kw, kb, dout, din):
        w = jax.random.normal(kw, (dout, din), jnp.float32) * 0.1
        b = jax.random.normal(kb, (dout,), jnp.float32) * 0.1
        return w, b

    w1, b1 = lin(ks[0], ks[1], h1, input_dim)
    w2, b2 = lin(ks[2], ks[3], h2, h1)
    w3, b3 = lin(ks[4], ks[5], 1, h2)

    # BatchNorm affine params / running stats (non-trivial but deterministic).
    g1 = 1.0 + 0.05 * jax.random.normal(ks[6], (h1,), jnp.float32)
    be1 = 0.05 * jax.random.normal(ks[7], (h1,), jnp.float32)
    m1 = 0.05 * jax.random.normal(ks[8], (h1,), jnp.float32)
    v1 = 1.0 + 0.1 * jnp.abs(jax.random.normal(ks[9], (h1,), jnp.float32))

    kk = jax.random.split(ks[10], 4)
    g2 = 1.0 + 0.05 * jax.random.normal(kk[0], (h2,), jnp.float32)
    be2 = 0.05 * jax.random.normal(kk[1], (h2,), jnp.float32)
    m2 = 0.05 * jax.random.normal(kk[2], (h2,), jnp.float32)
    v2 = 1.0 + 0.1 * jnp.abs(jax.random.normal(kk[3], (h2,), jnp.float32))

    return dict(w1=w1, b1=b1, g1=g1, be1=be1, m1=m1, v1=v1,
                w2=w2, b2=b2, g2=g2, be2=be2, m2=m2, v2=v2,
                w3=w3, b3=b3)


def reference_forward(x, p):
    """Plain-JAX f32 reference (eval-mode PyTorch semantics)."""
    z1 = x @ p["w1"].T + p["b1"]
    z1 = (z1 - p["m1"]) * (p["g1"] / jnp.sqrt(p["v1"] + BN_EPS)) + p["be1"]
    a1 = jnp.maximum(z1, 0.0)
    z2 = a1 @ p["w2"].T + p["b2"]
    z2 = (z2 - p["m2"]) * (p["g2"] / jnp.sqrt(p["v2"] + BN_EPS)) + p["be2"]
    a2 = jnp.maximum(z2, 0.0)
    return a2 @ p["w3"].T + p["b3"]


if __name__ == "__main__":
    key = jax.random.PRNGKey(0)
    kx, kp = jax.random.split(key)

    batch = 8
    input_dim = 32
    hidden_dims = [64, 64]

    x = jax.random.normal(kx, (batch, input_dim), jnp.float32)
    params = init_params(kp, input_dim, hidden_dims)

    out = neural_network_forward(x, params)
    out = jax.block_until_ready(out)

    ref = reference_forward(x, params)
    assert out.shape == (batch, 1), out.shape
    # bf16 matmul inputs / folded-BN bf16 weights (f32 accumulation) vs pure-f32
    # reference -> loose tolerance.
    max_diff = float(jnp.max(jnp.abs(out - ref)))
    assert jnp.allclose(out, ref, atol=3e-2, rtol=3e-2), (
        f"mismatch vs reference, max abs diff = {max_diff}")

    print("KERNEL_OK")
</pallas_src>

<mosaic_0001>
module attributes {stable_mosaic.version = 11 : i64} {
  func.func @mlp_kernel(%arg0: i32, %arg1: memref<128x32xf32, #tpu.memory_space<vmem>>, %arg2: memref<64x32xbf16, #tpu.memory_space<vmem>>, %arg3: memref<64x1xf32, #tpu.memory_space<vmem>>, %arg4: memref<64x64xbf16, #tpu.memory_space<vmem>>, %arg5: memref<64x1xf32, #tpu.memory_space<vmem>>, %arg6: memref<64x1xf32, #tpu.memory_space<vmem>>, %arg7: memref<1x1xf32, #tpu.memory_space<vmem>>, %arg8: memref<1x128xf32, #tpu.memory_space<vmem>>) attributes {dimension_semantics = [#tpu.dimension_semantics<parallel>], iteration_bounds = array<i64: 1>, scalar_prefetch = 0 : i64, scratch_operands = 0 : i64, tpu.core_type = #tpu.core_type<tc>, window_params = [{transform_indices = @transform_0, window_bounds = array<i64: 128, 32>}, {pipeline_mode = #tpu.pipeline_mode<synchronous>, transform_indices = @transform_1, window_bounds = array<i64: 64, 32>}, {pipeline_mode = #tpu.pipeline_mode<synchronous>, transform_indices = @transform_2, window_bounds = array<i64: 64, 1>}, {pipeline_mode = #tpu.pipeline_mode<synchronous>, transform_indices = @transform_3, window_bounds = array<i64: 64, 64>}, {pipeline_mode = #tpu.pipeline_mode<synchronous>, transform_indices = @transform_4, window_bounds = array<i64: 64, 1>}, {pipeline_mode = #tpu.pipeline_mode<synchronous>, transform_indices = @transform_5, window_bounds = array<i64: 64, 1>}, {pipeline_mode = #tpu.pipeline_mode<synchronous>, transform_indices = @transform_6, window_bounds = array<i64: 1, 1>}, {transform_indices = @transform_7, window_bounds = array<i64: 1, 128>}]} {
    %c0 = arith.constant 0 : index
    %c0_0 = arith.constant 0 : index
    %0 = vector.load %arg1[%c0, %c0_0] : memref<128x32xf32, #tpu.memory_space<vmem>>, vector<128x32xf32>
    %1 = arith.truncf %0 : vector<128x32xf32> to vector<128x32xbf16>
    %c0_1 = arith.constant 0 : index
    %c0_2 = arith.constant 0 : index
    %2 = vector.load %arg2[%c0_1, %c0_2] : memref<64x32xbf16, #tpu.memory_space<vmem>>, vector<64x32xbf16>
    %cst = arith.constant dense<0.000000e+00> : vector<64x128xf32>
    %3 = tpu.matmul %2, %1, %cst {dimension_numbers = #tpu.dot_dimension_numbers<[1], [1], [0], [0], [0, 0, 1, 0], [], []>} : vector<64x32xbf16>, vector<128x32xbf16>, vector<64x128xf32> -> vector<64x128xf32>
    %c0_3 = arith.constant 0 : index
    %c0_4 = arith.constant 0 : index
    %4 = vector.load %arg3[%c0_3, %c0_4] : memref<64x1xf32, #tpu.memory_space<vmem>>, vector<64x1xf32>
    %5 = vector.broadcast %4 : vector<64x1xf32> to vector<64x128xf32>
    %6 = arith.addf %3, %5 : vector<64x128xf32>
    %cst_5 = arith.constant 0.000000e+00 : f32
    %7 = vector.broadcast %cst_5 : f32 to vector<64x128xf32>
    %8 = arith.maximumf %6, %7 : vector<64x128xf32>
    %9 = arith.truncf %8 : vector<64x128xf32> to vector<64x128xbf16>
    %c0_6 = arith.constant 0 : index
    %c0_7 = arith.constant 0 : index
    %10 = vector.load %arg4[%c0_6, %c0_7] : memref<64x64xbf16, #tpu.memory_space<vmem>>, vector<64x64xbf16>
    %cst_8 = arith.constant dense<0.000000e+00> : vector<64x128xf32>
    %11 = tpu.matmul %10, %9, %cst_8 {dimension_numbers = #tpu.dot_dimension_numbers<[1], [0], [0], [1], [0, 0, 1, 1], [], []>} : vector<64x64xbf16>, vector<64x128xbf16>, vector<64x128xf32> -> vector<64x128xf32>
    %c0_9 = arith.constant 0 : index
    %c0_10 = arith.constant 0 : index
    %12 = vector.load %arg5[%c0_9, %c0_10] : memref<64x1xf32, #tpu.memory_space<vmem>>, vector<64x1xf32>
    %13 = vector.broadcast %12 : vector<64x1xf32> to vector<64x128xf32>
    %14 = arith.addf %11, %13 : vector<64x128xf32>
    %cst_11 = arith.constant 0.000000e+00 : f32
    %15 = vector.broadcast %cst_11 : f32 to vector<64x128xf32>
    %16 = arith.maximumf %14, %15 : vector<64x128xf32>
    %c0_12 = arith.constant 0 : index
    %c0_13 = arith.constant 0 : index
    %17 = vector.load %arg6[%c0_12, %c0_13] : memref<64x1xf32, #tpu.memory_space<vmem>>, vector<64x1xf32>
    %18 = vector.broadcast %17 : vector<64x1xf32> to vector<64x128xf32>
    %19 = arith.mulf %18, %16 : vector<64x128xf32>
    %cst_14 = arith.constant dense<0.000000e+00> : vector<128xf32>
    %20 = vector.multi_reduction <add>, %19, %cst_14 [0] : vector<64x128xf32> to vector<128xf32>
    %21 = vector.shape_cast %20 : vector<128xf32> to vector<1x128xf32>
    %c0_15 = arith.constant 0 : index
    %c0_16 = arith.constant 0 : index
    %22 = vector.load %arg7[%c0_15, %c0_16] : memref<1x1xf32, #tpu.memory_space<vmem>>, vector<1x1xf32>
    %23 = vector.broadcast %22 : vector<1x1xf32> to vector<1x128xf32>
    %24 = arith.addf %21, %23 : vector<1x128xf32>
    %c0_17 = arith.constant 0 : index
    %c0_18 = arith.constant 0 : index
    %25 = vector.load %arg8[%c0_17, %c0_18] : memref<1x128xf32, #tpu.memory_space<vmem>>, vector<1x128xf32>
    tpu.vector_store %arg8[%c0_17, %c0_18], %24 {strides = array<i32>} : memref<1x128xf32, #tpu.memory_space<vmem>>, vector<1x128xf32>,
    return
  }
  func.func @transform_0(%arg0: i32) -> (i32, i32) {
    %c0_i32 = arith.constant 0 : i32
    %c0_i32_0 = arith.constant 0 : i32
    return %arg0, %c0_i32 : i32, i32
  }
  func.func @transform_1(%arg0: i32) -> (i32, i32) {
    %c0_i32 = arith.constant 0 : i32
    %c0_i32_0 = arith.constant 0 : i32
    %c0_i32_1 = arith.constant 0 : i32
    return %c0_i32, %c0_i32_0 : i32, i32
  }
  func.func @transform_2(%arg0: i32) -> (i32, i32) {
    %c0_i32 = arith.constant 0 : i32
    %c0_i32_0 = arith.constant 0 : i32
    %c0_i32_1 = arith.constant 0 : i32
    return %c0_i32, %c0_i32_0 : i32, i32
  }
  func.func @transform_3(%arg0: i32) -> (i32, i32) {
    %c0_i32 = arith.constant 0 : i32
    %c0_i32_0 = arith.constant 0 : i32
    %c0_i32_1 = arith.constant 0 : i32
    return %c0_i32, %c0_i32_0 : i32, i32
  }
  func.func @transform_4(%arg0: i32) -> (i32, i32) {
    %c0_i32 = arith.constant 0 : i32
    %c0_i32_0 = arith.constant 0 : i32
    %c0_i32_1 = arith.constant 0 : i32
    return %c0_i32, %c0_i32_0 : i32, i32
  }
  func.func @transform_5(%arg0: i32) -> (i32, i32) {
    %c0_i32 = arith.constant 0 : i32
    %c0_i32_0 = arith.constant 0 : i32
    %c0_i32_1 = arith.constant 0 : i32
    return %c0_i32, %c0_i32_0 : i32, i32
  }
  func.func @transform_6(%arg0: i32) -> (i32, i32) {
    %c0_i32 = arith.constant 0 : i32
    %c0_i32_0 = arith.constant 0 : i32
    %c0_i32_1 = arith.constant 0 : i32
    return %c0_i32, %c0_i32_0 : i32, i32
  }
  func.func @transform_7(%arg0: i32) -> (i32, i32) {
    %c0_i32 = arith.constant 0 : i32
    %c0_i32_0 = arith.constant 0 : i32
    return %c0_i32, %arg0 : i32, i32
  }
}

</mosaic_0001>

<bundles_post_ra>
// kernel: tpu_custom_call.1
= control target key start
LH: loop header
LB: loop body
LE: loop exit
PB: predicated region body
PF: predicated region fallthrough
CT: control target
= control target key end

     0   :  { %s846_s0 = inlined_call_operand.vmem [shape: f32[128,32], index: 0, kind: input, shape index: {}]   ;;  %s847_s1 = inlined_call_operand.vmem [shape: bf16[64,32], index: 1, kind: input, shape index: {}]   ;;  %s848_s2 = inlined_call_operand.vmem [shape: f32[64,1], index: 2, kind: input, shape index: {}]   ;;  %s849_s3 = inlined_call_operand.vmem [shape: bf16[64,64], index: 3, kind: input, shape index: {}]   ;;  %s850_s4 = inlined_call_operand.vmem [shape: f32[64,1], index: 4, kind: input, shape index: {}]   ;;  %s851_s5 = inlined_call_operand.vmem [shape: f32[64,1], index: 5, kind: input, shape index: {}]   ;;  %s852_s6 = inlined_call_operand.<no memory space> [shape: f32[1,1], index: 6, kind: input, shape index: {}]   ;;  %s853_s7 = inlined_call_operand.hbm [shape: f32[1,128], index: 7, kind: output, shape index: {}]  }
   0x1   :  { %v12_v0 = vstv %s852_s6 }
   0x2   :  { %13 = vst [vmem:[#allocation2] sm:$0x1] %v12_v0 }
   0x3   :  { %v30_v1 = vld [vmem:[%s846_s0] sm:$0xff]  ;;  %v31_v2 = vld [vmem:[%s846_s0 + $0x8] sm:$0xff]  ;;  %vm130_vm0 = vcmask 261120   ;;  %v32_v3 = vld [vmem:[%s846_s0 + $0x10] sm:$0xff]  ;;  %v621_v6 = vmov 0  }
   0x4   :  { %v46_v4 = vpack.c.bf16 %v31_v2, %v30_v1  ;;  %v33_v5 = vld [vmem:[%s846_s0 + $0x18] sm:$0xff]  ;;  %587 = vset.pattern.permute.xlu0 %v621_v6  ;;  %588 = vset.pattern.permute.xlu1 %v621_v6  ;;  %v34_v9 = vld [vmem:[%s846_s0 + $0x20] sm:$0xff]  ;;  %v35_v10 = vld [vmem:[%s846_s0 + $0x28] sm:$0xff] }
   0x5   :  { %v47_v7 = vpack.c.bf16 %v33_v5, %v32_v3  ;;  %v589_v11 = vld [vmem:[%s847_s1] sm:$0xff]   ;;  %v48_v13 = vpack.c.bf16 %v35_v10, %v34_v9  ;;  %v64_v15 = vld [vmem:[%s848_s2 + $0x10] sm:$0xff]  ;;  %v63_v16 = vld [vmem:[%s848_s2 + $0x8] sm:$0xff] }
   0x6   :  { %577 = vmatprep.subr.msk.bf16.mxu0 %vm130_vm0, %v46_v4  ;;  %v144_v8 = vsel %vm130_vm0, %v46_v4, 0  ;;  %553 = vmatprep.mubr.msk.bf16.mxu0 %vm130_vm0, %v589_v11  ;;  %v62_v14 = vld [vmem:[%s848_s2] sm:$0xff]  ;;  %v65_v17 = vld [vmem:[%s848_s2 + $0x18] sm:$0xff]  ;;  %v36_v18 = vld [vmem:[%s846_s0 + $0x30] sm:$0xff] }
   0x7   :  { %538 = vmatpush3.bf16.xpose.msra.mxu0 %v144_v8  ;;  %v147_v12 = vsel %vm130_vm0, %v47_v7, 0  ;;  %72 = vperm.xlu0 %587, %v62_v14   ;;  %v37_v19 = vld [vmem:[%s846_s0 + $0x38] sm:$0xff]  ;;  %v66_v20 = vld [vmem:[%s848_s2 + $0x20] sm:$0xff]  ;;  %v67_v21 = vld [vmem:[%s848_s2 + $0x28] sm:$0xff]  ;;  %v150_v22 = vsel %vm130_vm0, %v48_v13, 0 }
   0x8   :  { %578 = vmatprep.subr.msk.bf16.mxu0 %vm130_vm0, %v47_v7  ;;  %82 = vperm.xlu1 %588, %v64_v15   ;;  %v49_v23 = vpack.c.bf16 %v37_v19, %v36_v18  ;;  %v68_v24 = vld [vmem:[%s848_s2 + $0x30] sm:$0xff]  ;;  %v69_v25 = vld [vmem:[%s848_s2 + $0x38] sm:$0xff] }
   0xb   :  { %77 = vperm.xlu0 %587, %v63_v16  }
   0xc   :  { %87 = vperm.xlu1 %588, %v65_v17  }
   0xf   :  { %540 = vmatpush3.bf16.xpose.msra.mxu0 %v147_v12  ;;  %92 = vperm.xlu0 %587, %v66_v20  }
  0x10   :  { %579 = vmatprep.subr.msk.bf16.mxu0 %vm130_vm0, %v48_v13  ;;  %97 = vperm.xlu1 %588, %v67_v21  }
  0x17   :  { %542 = vmatpush3.bf16.xpose.msra.mxu0 %v150_v22 }
  0x18   :  { %14 = vsyncpa [#allocation4], 0  ;;  %580 = vmatprep.subr.msk.bf16.mxu0 %vm130_vm0, %v49_v23  ;;  %v38_v26 = vld [vmem:[%s846_s0 + $0x40] sm:$0xff]  ;;  %v39_v27 = vld [vmem:[%s846_s0 + $0x48] sm:$0xff]  ;;  %102 = vperm.xlu0 %587, %v68_v24   ;;  %v153_v30 = vsel %vm130_vm0, %v49_v23, 0  ;;  %vm320_vm1 = vcmask 523264  }
  0x19   :  { %v252_v28 = vld [vmem:[%s850_s4] sm:$0xff]  ;;  %107 = vperm.xlu1 %588, %v69_v25   ;;  %v253_v29 = vld [vmem:[%s850_s4 + $0x8] sm:$0xff]  ;;  %v50_v31 = vpack.c.bf16 %v39_v27, %v38_v26  ;;  %v254_v32 = vld [vmem:[%s850_s4 + $0x10] sm:$0xff] }
  0x1a   :  { %v255_v33 = vld [vmem:[%s850_s4 + $0x18] sm:$0xff]  ;;  %v40_v34 = vld [vmem:[%s846_s0 + $0x50] sm:$0xff]  ;;  %v406_v36 = vld [vmem:[%s851_s5] sm:$0xff] }
  0x1b   :  { %v41_v35 = vld [vmem:[%s846_s0 + $0x58] sm:$0xff]  ;;  %v407_v37 = vld [vmem:[%s851_s5 + $0x8] sm:$0xff]  ;;  %v156_v38 = vsel %vm130_vm0, %v50_v31, 0  ;;  %v256_v40 = vld [vmem:[%s850_s4 + $0x20] sm:$0xff] }
  0x1c   :  { %262 = vperm.xlu0 %587, %v252_v28   ;;  %v51_v39 = vpack.c.bf16 %v41_v35, %v40_v34  ;;  %v408_v41 = vld [vmem:[%s851_s5 + $0x10] sm:$0xff]  ;;  %v42_v42 = vld [vmem:[%s846_s0 + $0x60] sm:$0xff]  ;;  %v43_v43 = vld [vmem:[%s846_s0 + $0x68] sm:$0xff] }
  0x1d   :  { %267 = vperm.xlu1 %588, %v253_v29   ;;  %v257_v44 = vld [vmem:[%s850_s4 + $0x28] sm:$0xff]  ;;  %v409_v45 = vld [vmem:[%s851_s5 + $0x18] sm:$0xff]  ;;  %v52_v47 = vpack.c.bf16 %v43_v43, %v42_v42  ;;  %v258_v48 = vld [vmem:[%s850_s4 + $0x30] sm:$0xff] }
  0x1e   :  { %v159_v46 = vsel %vm130_vm0, %v51_v39, 0  ;;  %v410_v49 = vld [vmem:[%s851_s5 + $0x20] sm:$0xff]  ;;  %v44_v50 = vld [vmem:[%s846_s0 + $0x70] sm:$0xff]  ;;  %v45_v51 = vld [vmem:[%s846_s0 + $0x78] sm:$0xff] }
  0x1f   :  { %544 = vmatpush3.bf16.xpose.msra.mxu0 %v153_v30  ;;  %v259_v52 = vld [vmem:[%s850_s4 + $0x38] sm:$0xff]  ;;  %v411_v53 = vld [vmem:[%s851_s5 + $0x28] sm:$0xff]  ;;  %v162_v54 = vsel %vm130_vm0, %v52_v47, 0  ;;  %v53_v55 = vpack.c.bf16 %v45_v51, %v44_v50  ;;  %v412_v56 = vld [vmem:[%s851_s5 + $0x30] sm:$0xff] }
  0x20   :  { %581 = vmatprep.subr.msk.bf16.mxu0 %vm130_vm0, %v50_v31  ;;  %272 = vperm.xlu0 %587, %v254_v32   ;;  %v413_v57 = vld [vmem:[%s851_s5 + $0x38] sm:$0xff]  ;;  %v475_v58 = vld [vmem:[#allocation2] sm:$0x1]  ;;  %v590_v60 = vld [vmem:[%s847_s1 + $0x8] sm:$0xff]  }
  0x21   :  { %277 = vperm.xlu1 %588, %v255_v33   ;;  %v165_v59 = vsel %vm130_vm0, %v53_v55, 0  ;;  %v591_v61 = vld [vmem:[%s847_s1 + $0x10] sm:$0xff]   ;;  %v592_v62 = vld [vmem:[%s847_s1 + $0x18] sm:$0xff]   ;;  %v593_v63 = vld [vmem:[%s849_s3] sm:$0xff]  }
  0x22   :  { %569 = vmatprep.mubr.msk.bf16.mxu1 %vm320_vm1, %v593_v63 }
  0x24   :  { %416 = vperm.xlu0 %587, %v406_v36   ;;  %v594_v36 = vld [vmem:[%s849_s3 + $0x8] sm:$0xff]  }
  0x25   :  { %421 = vperm.xlu1 %588, %v407_v37   ;;  %v595_v37 = vld [vmem:[%s849_s3 + $0x10] sm:$0xff]  }
  0x27   :  { %546 = vmatpush3.bf16.xpose.msra.mxu0 %v156_v38  ;;  %v596_v38 = vld [vmem:[%s849_s3 + $0x18] sm:$0xff]   ;;  %s622_s3 = smov [#allocation3]  }
  0x28   :  { %582 = vmatprep.subr.msk.bf16.mxu0 %vm130_vm0, %v51_v39  ;;  %282 = vperm.xlu0 %587, %v256_v40   ;;  %s493_s2 = sshll.u32 %s622_s3, 4  ;;  %s494_s2 = int_to_ptr.vmem [resolvable:$true] %s493_s2 }
  0x29   :  { %426 = vperm.xlu1 %588, %v408_v41   ;;  %s597_s20 = scalar_lea.vmem %s494_s2, 16  ;;  %s601_s21 = scalar_lea.vmem %s494_s2, 32 }
  0x2a   :  { %p598_p0 = scmp.ne.s32.totalorder %s494_s2, %s597_s20  ;;  %p602_p1 = scmp.lt.s32.totalorder %s494_s2, %s494_s2 }
  0x2b   :  { %p603_p2 = scmp.lt.s32.totalorder %s601_s21, %s597_s20 }
  0x2c   :  { %287 = vperm.xlu0 %587, %v257_v44  }
  0x2d   :  { %431 = vperm.xlu1 %588, %v409_v45   ;;  %p604_p3 = por %p603_p2, %p602_p1 }
  0x2f   :  { %548 = vmatpush3.bf16.xpose.msra.mxu0 %v159_v46  ;;  %p605_p4 = pnand %p604_p3, %p598_p0 }
  0x30   :  { %583 = vmatprep.subr.msk.bf16.mxu0 %vm130_vm0, %v52_v47  ;;  %292 = vperm.xlu0 %587, %v258_v48  }
  0x31   :  { %436 = vperm.xlu1 %588, %v410_v49  }
  0x34   :  { %297 = vperm.xlu0 %587, %v259_v52  }
  0x35   :  { %441 = vperm.xlu1 %588, %v411_v53  }
  0x37   :  { %550 = vmatpush3.bf16.xpose.msra.mxu0 %v162_v54 }
  0x38   :  { %584 = vmatprep.subr.msk.bf16.mxu0 %vm130_vm0, %v53_v55  ;;  %446 = vperm.xlu0 %587, %v412_v56  }
  0x39   :  { %451 = vperm.xlu1 %588, %v413_v57  }
  0x3c   :  { %478 = vperm.xlu0 %587, %v475_v58  }
  0x3f   :  { %552 = vmatpush3.bf16.xpose.msra.mxu0 %v165_v59 }
  0x46   :  { %554 = vmatmul.mubr.msk.bf16.vlgmr.msra.gmra.mrb[0].mxu0 %vm130_vm0, %v590_v60 }
  0x47   :  { %557 = vmatprep.mubr.msk.bf16.mxu0 %vm130_vm0, %v591_v61 }
  0x4e   :  { %558 = vmatmul.mubr.msk.bf16.gmra.mrb[4].mxu0 %vm130_vm0, %v592_v62 }
  0x86   :  { %v73_v0 = vpop.permute.xlu0 %72 }
  0x87   :  { %v83_v1 = vpop.permute.xlu1 %82 }
  0x8a   :  { %v78_v2 = vpop.permute.xlu0 %77 }
  0x8b   :  { %v88_v3 = vpop.permute.xlu1 %87 }
  0x8e   :  { %v93_v7 = vpop.permute.xlu0 %92 }
  0x8f   :  { %v98_v12 = vpop.permute.xlu1 %97 }
  0x97   :  { %v103_v19 = vpop.permute.xlu0 %102 }
  0x98   :  { %v108_v24 = vpop.permute.xlu1 %107 }
  0x9b   :  { %v263_v39 = vpop.permute.xlu0 %262 }
  0x9c   :  { %v268_v40 = vpop.permute.xlu1 %267 }
  0x9f   :  { %v273_v41 = vpop.permute.xlu0 %272 }
  0xa0   :  { %v278_v42 = vpop.permute.xlu1 %277 }
  0xa3   :  { %v417_v43 = vpop.permute.xlu0 %416 }
  0xa4   :  { %v422_v44 = vpop.permute.xlu1 %421 }
  0xa7   :  { %v283_v45 = vpop.permute.xlu0 %282 }
  0xa8   :  { %v427_v46 = vpop.permute.xlu1 %426 }
  0xab   :  { %v288_v47 = vpop.permute.xlu0 %287 }
  0xac   :  { %v432_v49 = vpop.permute.xlu1 %431 }
  0xaf   :  { %v293_v58 = vpop.permute.xlu0 %292 }
  0xb0   :  { %v437_v61 = vpop.permute.xlu1 %436 }
 0x119   :  { %v555_v4 = vpop.f32.mrb[0].mxu0 }
 0x11a   :  { %v210_v5 = vadd.f32 %v555_v4, %v83_v1  ;;  %v201_v6 = vpop.f32.mrb[1].mxu0 }
 0x11b   :  { %v202_v8 = vadd.f32 %v201_v6, %v73_v0  ;;  %v556_v9 = vpop.f32.mrb[2].mxu0 }
 0x11c   :  { %v213_v10 = vadd.f32 %v556_v9, %v88_v3  ;;  %v204_v11 = vpop.f32.mrb[3].mxu0  ;;  %v234_v14 = vmax.f32 %v210_v5, 0.0 }
 0x11d   :  { %v205_v13 = vadd.f32 %v204_v11, %v78_v2  ;;  %v232_v16 = vmax.f32 %v202_v8, 0.0  ;;  %v298_v8 = vpop.permute.xlu0 %297 }
 0x11e   :  { %v235_v15 = vmax.f32 %v213_v10, 0.0 }
 0x11f   :  { %v233_v17 = vmax.f32 %v205_v13, 0.0 }
 0x120   :  { %v241_v18 = vpack.c.bf16 %v235_v15, %v234_v14  ;;  %v442_v15 = vpop.permute.xlu1 %441 }
 0x121   :  { %v559_v20 = vpop.f32.mrb[4].mxu0  ;;  %v240_v21 = vpack.c.bf16 %v233_v17, %v232_v16 }
 0x122   :  { %v226_v22 = vadd.f32 %v559_v20, %v103_v19  ;;  %v217_v23 = vpop.f32.mrb[5].mxu0 }
 0x123   :  { %v218_v25 = vadd.f32 %v217_v23, %v93_v7  ;;  %v560_v26 = vpop.f32.mrb[6].mxu0  ;;  %561 = vmatprep.subr.bf16.mxu1 %v240_v21  ;;  %v447_v23 = vpop.permute.xlu0 %446 }
 0x124   :  { %v229_v27 = vadd.f32 %v560_v26, %v108_v24  ;;  %v220_v28 = vpop.f32.mrb[7].mxu0  ;;  %562 = vmatpush3.bf16.msra.mxu1 %v240_v21  ;;  %v238_v30 = vmax.f32 %v226_v22, 0.0  ;;  %v452_v26 = vpop.permute.xlu1 %451 }
 0x125   :  { %v221_v29 = vadd.f32 %v220_v28, %v98_v12  ;;  %563 = vmatprep.subr.bf16.mxu1 %v241_v18  ;;  %v236_v32 = vmax.f32 %v218_v25, 0.0 }
 0x126   :  { %v239_v31 = vmax.f32 %v229_v27, 0.0 }
 0x127   :  { %v237_v33 = vmax.f32 %v221_v29, 0.0  ;;  %v481_v29 = vlaneseq }
 0x128   :  { %v243_v34 = vpack.c.bf16 %v239_v31, %v238_v30  ;;  %564 = vmatpush3.bf16.msra.mxu1 %v241_v18 }
 0x129   :  { %v242_v35 = vpack.c.bf16 %v237_v33, %v236_v32  ;;  %v482_v32 = vshrl.u32 %v481_v29, 7 }
 0x12b   :  { %565 = vmatprep.subr.bf16.mxu1 %v242_v35 }
 0x12c   :  { %566 = vmatpush3.bf16.msra.mxu1 %v242_v35  ;;  %v483_v35 = vsub.s32 0, %v482_v32 }
 0x12d   :  { %567 = vmatprep.subr.bf16.mxu1 %v243_v34 }
 0x130   :  { %568 = vmatpush3.bf16.msra.mxu1 %v243_v34 }
 0x133   :  { %570 = vmatmul.mubr.msk.bf16.vlgmr.msra.gmra.mrb[0].mxu1 %vm320_vm1, %v594_v36 }
 0x134   :  { %573 = vmatprep.mubr.msk.bf16.mxu1 %vm320_vm1, %v595_v37  ;;  %v479_v37 = vpop.permute.xlu0 %478 }
 0x13b   :  { %574 = vmatmul.mubr.msk.bf16.gmra.mrb[4].mxu1 %vm320_vm1, %v596_v38 }
 0x206   :  { %v571_v48 = vpop.f32.mrb[0].mxu1 }
 0x207   :  { %v367_v50 = vpop.f32.mrb[1].mxu1  ;;  %v376_v51 = vadd.f32 %v571_v48, %v273_v41 }
 0x208   :  { %v368_v52 = vadd.f32 %v367_v50, %v263_v39  ;;  %v572_v53 = vpop.f32.mrb[2].mxu1  ;;  %v484_v39 = vrot.slane %v479_v37, %v483_v35 }
 0x209   :  { %v379_v54 = vadd.f32 %v572_v53, %v278_v42  ;;  %v370_v55 = vpop.f32.mrb[3].mxu1  ;;  %v400_v59 = vmax.f32 %v376_v51, 0.0 }
 0x20a   :  { %v398_v56 = vmax.f32 %v368_v52, 0.0  ;;  %v371_v57 = vadd.f32 %v370_v55, %v268_v40 }
 0x20b   :  { %v401_v62 = vmax.f32 %v379_v54, 0.0  ;;  %v456_v3 = vmul.f32 %v427_v46, %v400_v59 }
 0x20c   :  { %v399_v60 = vmax.f32 %v371_v57, 0.0  ;;  %v454_v63 = vmul.f32 %v417_v43, %v398_v56 }
 0x20d   :  { %v457_v9 = vmul.f32 %v432_v49, %v401_v62 }
 0x20e   :  { %v455_v0 = vmul.f32 %v422_v44, %v399_v60  ;;  %v575_v1 = vpop.f32.mrb[4].mxu1 }
 0x20f   :  { %v383_v2 = vpop.f32.mrb[5].mxu1  ;;  %v392_v5 = vadd.f32 %v575_v1, %v293_v58 }
 0x210   :  { %v462_v4 = vadd.f32 %v455_v0, %v454_v63  ;;  %v384_v6 = vadd.f32 %v383_v2, %v283_v45  ;;  %v576_v7 = vpop.f32.mrb[6].mxu1 }
 0x211   :  { %v386_v10 = vpop.f32.mrb[7].mxu1  ;;  %v395_v13 = vadd.f32 %v576_v7, %v298_v8  ;;  %v404_v16 = vmax.f32 %v392_v5, 0.0 }
 0x212   :  { %v463_v11 = vadd.f32 %v462_v4, %v456_v3  ;;  %v402_v12 = vmax.f32 %v384_v6, 0.0  ;;  %v387_v14 = vadd.f32 %v386_v10, %v288_v47 }
 0x213   :  { %v405_v21 = vmax.f32 %v395_v13, 0.0  ;;  %v460_v24 = vmul.f32 %v447_v23, %v404_v16 }
 0x214   :  { %v458_v17 = vmul.f32 %v437_v61, %v402_v12  ;;  %v464_v18 = vadd.f32 %v463_v11, %v457_v9  ;;  %v403_v19 = vmax.f32 %v387_v14, 0.0 }
 0x215   :  { %v461_v27 = vmul.f32 %v452_v26, %v405_v21 }
 0x216   :  { %v465_v20 = vadd.f32 %v464_v18, %v458_v17  ;;  %v459_v22 = vmul.f32 %v442_v15, %v403_v19 }
 0x218   :  { %v466_v25 = vadd.f32 %v465_v20, %v459_v22 }
 0x21a   :  { %v467_v28 = vadd.f32 %v466_v25, %v460_v24 }
 0x21c   :  { %v468_v30 = vadd.f32 %v467_v28, %v461_v27 }
 0x21e   :  { %v469_v31 = vrot.slane %v468_v30, 4 }
 0x220   :  { %v470_v33 = vadd.f32 %v469_v31, %v468_v30 }
 0x222   :  { %v471_v34 = vrot.slane %v470_v33, 2 }
 0x224   :  { %v472_v36 = vadd.f32 %v471_v34, %v470_v33 }
 0x226   :  { %v473_v38 = vrot.slane %v472_v36, 1 }
 0x228   :  { %v474_v40 = vadd.f32 %v473_v38, %v472_v36 }
 0x22a   :  { %v485_v41 = vadd.f32 %v484_v39, %v474_v40 }
 0x22c   :  { %486 = vst [vmem:[#allocation3] sm:$0x1] %v485_v41 }
 0x22d   :  { %608 = shalt.err (!%p605_p4)
}
 0x22e   :  { %s609_s24 = scalar_lea.hbm %s853_s7, 16 }
 0x22f   :  { %p610_p5 = scmp.ne.s32.totalorder %s853_s7, %s609_s24  ;;  %p613_p6 = scmp.lt.u32.totalorder %s609_s24, %s853_s7 }
 0x231   :  { %p615_p7 = pnand %p613_p6, %p610_p5 }
 0x233   :  { %618 = shalt.err (!%p615_p7)
}
 0x234   :  { %496 = dma.vmem_to_hbm [thread:$0]  %s494_s2, 16, %s853_s7, [#allocation4]  }
 0x235   :  { %619 = dma.done.wait [#allocation4], 16  }
 0x236   :  { %620 = vsyncadd [#allocation4], 4294967280 }
 0x237   :  { %500 = vsyncpa [#allocation4], 1 }

</bundles_post_ra>
